<compile_context>
chip_gen: v7x
topology: tpu7x:2x2x1
jax: 0.10.0
libtpu: 0.0.40
codegen_flags: <defaults>
</compile_context>

<pallas_src>
import jax
import jax.numpy as jnp
from jax.experimental import pallas as pl
from jax.experimental.pallas import tpu as pltpu
import numpy as np

# Standard JPEG luminance quantization table (same values as DiffJPEG's y_table).
Y_TABLE = np.array(
    [
        [16, 11, 10, 16, 24, 40, 51, 61],
        [12, 12, 14, 19, 26, 58, 60, 55],
        [14, 13, 16, 24, 40, 57, 69, 56],
        [14, 17, 22, 29, 51, 87, 80, 62],
        [18, 22, 37, 56, 68, 109, 103, 77],
        [24, 35, 55, 64, 81, 104, 113, 92],
        [49, 64, 78, 87, 103, 121, 120, 101],
        [72, 92, 95, 98, 112, 100, 103, 99],
    ],
    dtype=np.float32,
)

LANE = 512             # lane-dense row width: 8 whole 8x8 blocks, multiple of 128
MAX_BLOCK_ROWS = 2048  # 2048 x 512 f32 = 4 MiB per buffer; with double-buffered
                       # in + out that's <= 16 MiB, well inside the raised vmem limit
                       # on v5e/v6e/v7x and amortizes the ~0.35 us per-grid-step cost.
VMEM_LIMIT_BYTES = 64 << 20


def _y_quantize_kernel(img_ref, table_ref, out_ref):
    # Elementwise hot path: cast (== image.float()), divide by the pre-scaled table
    # row (broadcasts over sublanes) and round.  jnp.round == torch.round
    # (round-half-to-even).  The divide is kept for bit-exact parity with
    # torch.round(x / (y_table * factor)); it is hidden under HBM bandwidth.
    x = img_ref[...].astype(jnp.float32)
    out_ref[...] = jnp.round(x / table_ref[...]).astype(out_ref.dtype)


def _y_quantize_slab(slab, table_row, out_dtype):
    """Run the Pallas kernel on a (rows, LANE) slab.  rows may be any positive int."""
    rows = slab.shape[0]
    block_rows = rows if rows <= MAX_BLOCK_ROWS else MAX_BLOCK_ROWS
    grid = pl.cdiv(rows, block_rows)   # partial last block is masked by Pallas

    return pl.pallas_call(
        _y_quantize_kernel,
        out_shape=jax.ShapeDtypeStruct((rows, LANE), out_dtype),
        grid_spec=pltpu.PrefetchScalarGridSpec(
            num_scalar_prefetch=0,
            grid=(grid,),
            in_specs=[
                pl.BlockSpec((block_rows, LANE), lambda i: (i, 0)),
                pl.BlockSpec((1, LANE), lambda i: (0, 0)),  # tiny, same block each step
            ],
            out_specs=pl.BlockSpec((block_rows, LANE), lambda i: (i, 0)),
        ),
        compiler_params=pltpu.CompilerParams(
            # independent grid axis -> shards across the 2 TensorCores on v7x
            dimension_semantics=("parallel",),
            vmem_limit_bytes=VMEM_LIMIT_BYTES,
        ),
    )(slab, table_row)


def y_quantize(image, factor=1.0, out_dtype=jnp.float32):
    """JPEG quantization for the Y channel.

    Args:
      image: (N, 8, 8) array of DCT blocks (any float/int dtype; cast in-kernel).
      factor: degree of compression (python float or traced scalar; no recompile).
      out_dtype: output dtype.  float32 (default) is bit-exact with the PyTorch
        module; jnp.int16 halves HBM writeback (~25% end-to-end) if parity is not
        required.

    Returns:
      (N, 8, 8) array of quantized coefficients.
    """
    n = image.shape[0]
    assert image.shape[1:] == (8, 8), "expected (N, 8, 8) DCT blocks"

    # factor folded into the table once, outside the kernel.
    table64 = jnp.asarray(Y_TABLE).reshape(-1) * jnp.asarray(factor, jnp.float32)

    n_main = (n // 8) * 8          # largest prefix that is LANE-aligned (8 blocks/row)
    n_tail = n - n_main

    outs = []
    if n_main:
        rows = (n_main * 64) // LANE
        # Zero-copy reshape on the common aligned path (no pad, no slice).
        main = image if n_tail == 0 else image[:n_main]
        slab = main.reshape(rows, LANE)
        # The 64-entry table repeats 8x per 512-wide row; 512 % 64 == 0 so block
        # boundaries line up with the row-major flatten of (N, 8, 8).
        table_row = jnp.tile(table64, LANE // 64).reshape(1, LANE)
        out_slab = _y_quantize_slab(slab, table_row, out_dtype)
        outs.append(out_slab.reshape(n_main, 8, 8))

    if n_tail:
        # Rare (<8 blocks) remainder: plain jnp is cheaper than padding whole tiles.
        tail = image[n_main:].astype(jnp.float32)
        outs.append(jnp.round(tail / table64.reshape(8, 8)).astype(out_dtype))

    return outs[0] if len(outs) == 1 else jnp.concatenate(outs, axis=0)


if __name__ == "__main__":
    k1, k2, k3 = jax.random.split(jax.random.PRNGKey(0), 3)
    yt = jnp.asarray(Y_TABLE)

    # 1) Small aligned case (single block: block_rows == rows == 1).
    x1 = jax.random.normal(k1, (8, 8, 8), dtype=jnp.float32) * 100.0
    o1 = jax.block_until_ready(y_quantize(x1, factor=1.0))
    assert o1.shape == (8, 8, 8) and o1.dtype == jnp.float32
    np.testing.assert_allclose(np.asarray(o1), np.asarray(jnp.round(x1 / yt)), atol=0.0)

    # 2) Unaligned N (exercises the plain-jnp tail + concat path).
    x2 = jax.random.normal(k2, (13, 8, 8), dtype=jnp.float32) * 50.0
    o2 = jax.block_until_ready(y_quantize(x2, factor=2.0))
    np.testing.assert_allclose(
        np.asarray(o2), np.asarray(jnp.round(x2 / (yt * jnp.float32(2.0)))), atol=0.0
    )

    # 3) Multi-step grid with a partial (masked) last block: rows = 2051, grid = 2.
    x3 = jax.random.normal(k3, (8 * 2051, 8, 8), dtype=jnp.float32) * 75.0
    o3 = jax.block_until_ready(y_quantize(x3, factor=1.0))
    np.testing.assert_allclose(np.asarray(o3), np.asarray(jnp.round(x3 / yt)), atol=0.0)

    # 4) Opt-in int16 output (halves writeback; not bit-identical dtype to PyTorch).
    o4 = jax.block_until_ready(y_quantize(x1, factor=1.0, out_dtype=jnp.int16))
    np.testing.assert_allclose(
        np.asarray(o4), np.asarray(jnp.round(x1 / yt)).astype(np.int16), atol=0.0
    )

    print("KERNEL_OK")
</pallas_src>

<mosaic_0001>
module attributes {stable_mosaic.version = 11 : i64} {
  func.func @_y_quantize_kernel(%arg0: i32, %arg1: memref<1x512xf32, #tpu.memory_space<vmem>>, %arg2: memref<1x512xf32, #tpu.memory_space<vmem>>, %arg3: memref<1x512xf32, #tpu.memory_space<vmem>>) attributes {dimension_semantics = [#tpu.dimension_semantics<parallel>], iteration_bounds = array<i64: 1>, scalar_prefetch = 0 : i64, scratch_operands = 0 : i64, tpu.core_type = #tpu.core_type<tc>, window_params = [{transform_indices = @transform_0, window_bounds = array<i64: 1, 512>}, {pipeline_mode = #tpu.pipeline_mode<synchronous>, transform_indices = @transform_1, window_bounds = array<i64: 1, 512>}, {transform_indices = @transform_2, window_bounds = array<i64: 1, 512>}]} {
    %c0 = arith.constant 0 : index
    %c0_0 = arith.constant 0 : index
    %0 = vector.load %arg1[%c0, %c0_0] : memref<1x512xf32, #tpu.memory_space<vmem>>, vector<1x512xf32>
    %c0_1 = arith.constant 0 : index
    %c0_2 = arith.constant 0 : index
    %1 = vector.load %arg2[%c0_1, %c0_2] : memref<1x512xf32, #tpu.memory_space<vmem>>, vector<1x512xf32>
    %2 = arith.divf %0, %1 : vector<1x512xf32>
    %3 = math.roundeven %2 : vector<1x512xf32>
    %c0_3 = arith.constant 0 : index
    %c0_4 = arith.constant 0 : index
    %4 = vector.load %arg3[%c0_3, %c0_4] : memref<1x512xf32, #tpu.memory_space<vmem>>, vector<1x512xf32>
    tpu.vector_store %arg3[%c0_3, %c0_4], %3 {strides = array<i32>} : memref<1x512xf32, #tpu.memory_space<vmem>>, vector<1x512xf32>,
    return
  }
  func.func @transform_0(%arg0: i32) -> (i32, i32) {
    %c0_i32 = arith.constant 0 : i32
    %c0_i32_0 = arith.constant 0 : i32
    return %arg0, %c0_i32 : i32, i32
  }
  func.func @transform_1(%arg0: i32) -> (i32, i32) {
    %c0_i32 = arith.constant 0 : i32
    %c0_i32_0 = arith.constant 0 : i32
    %c0_i32_1 = arith.constant 0 : i32
    return %c0_i32, %c0_i32_0 : i32, i32
  }
  func.func @transform_2(%arg0: i32) -> (i32, i32) {
    %c0_i32 = arith.constant 0 : i32
    %c0_i32_0 = arith.constant 0 : i32
    return %arg0, %c0_i32 : i32, i32
  }
}

</mosaic_0001>

<bundles_post_ra>
// kernel: tpu_custom_call.1
= control target key start
LH: loop header
LB: loop body
LE: loop exit
PB: predicated region body
PF: predicated region fallthrough
CT: control target
= control target key end

     0   :  { %7 = vsyncpa [#allocation3], 0  ;;  %s194_s0 = inlined_call_operand.hbm [shape: f32[1,512], index: 0, kind: input, shape index: {}]   ;;  %s195_s1 = inlined_call_operand.hbm [shape: f32[1,512], index: 1, kind: input, shape index: {}]   ;;  %s196_s2 = inlined_call_operand.hbm [shape: f32[1,512], index: 2, kind: output, shape index: {}]  }
   0x1   :  { %8 = vsyncpa [#allocation6], 0 }
   0x2   :  { %9 = vsyncpa [#allocation4], 0  ;;  %s140_s9 = smov [#allocation2]   ;;  %s141_s11 = smov [#allocation5]  }
   0x3   :  { %s16_s10 = sshll.u32 %s140_s9, 4  ;;  %s26_s12 = sshll.u32 %s141_s11, 4  ;;  %s17_s10 = int_to_ptr.vmem [resolvable:$true] %s16_s10  ;;  %s27_s12 = int_to_ptr.vmem [resolvable:$true] %s26_s12 }
   0x4   :  { %s68_s15 = scalar_lea.hbm %s194_s0, 64 }
   0x5   :  { %p69_p0 = scmp.ne.s32.totalorder %s194_s0, %s68_s15  ;;  %p72_p1 = scmp.lt.u32.totalorder %s68_s15, %s194_s0 }
   0x7   :  { %p74_p2 = pnand %p72_p1, %p69_p0 }
   0x9   :  { %77 = shalt.err (!%p74_p2)
}
   0xa   :  { %s78_s20 = scalar_lea.vmem %s17_s10, 64  ;;  %p83_p4 = scmp.lt.s32.totalorder %s17_s10, %s17_s10 }
   0xb   :  { %p79_p3 = scmp.ne.s32.totalorder %s17_s10, %s78_s20  ;;  %p84_p5 = scmp.lt.s32.totalorder %s78_s20, %s78_s20 }
   0xd   :  { %p85_p6 = por %p84_p5, %p83_p4 }
   0xf   :  { %p86_p7 = pnand %p85_p6, %p79_p3 }
  0x11   :  { %89 = shalt.err (!%p86_p7)
}
  0x12   :  { %19 = dma.hbm_to_vmem [thread:$0]  %s194_s0, 64, %s17_s10, [#allocation3]  }
  0x13   :  { %s90_s25 = scalar_lea.hbm %s195_s1, 64 }
  0x14   :  { %p91_p8 = scmp.ne.s32.totalorder %s195_s1, %s90_s25  ;;  %p94_p9 = scmp.lt.u32.totalorder %s90_s25, %s195_s1 }
  0x16   :  { %p96_p10 = pnand %p94_p9, %p91_p8 }
  0x18   :  { %99 = shalt.err (!%p96_p10)
}
  0x19   :  { %s100_s30 = scalar_lea.vmem %s27_s12, 64  ;;  %p105_p12 = scmp.lt.s32.totalorder %s27_s12, %s27_s12 }
  0x1a   :  { %p101_p11 = scmp.ne.s32.totalorder %s27_s12, %s100_s30  ;;  %p106_p13 = scmp.lt.s32.totalorder %s100_s30, %s100_s30 }
  0x1c   :  { %p107_p0 = por %p106_p13, %p105_p12 }
  0x1e   :  { %p108_p1 = pnand %p107_p0, %p101_p11 }
  0x20   :  { %111 = shalt.err (!%p108_p1)
}
  0x21   :  { %29 = dma.hbm_to_vmem [thread:$0]  %s195_s1, 64, %s27_s12, [#allocation6]  }
  0x22   :  { %134 = dma.done.wait [#allocation3], 64  }
  0x23   :  { %135 = vsyncadd [#allocation3], 4294967232 }
  0x24   :  { %136 = dma.done.wait [#allocation6], 64  }
  0x25   :  { %137 = vsyncadd [#allocation6], 4294967232  ;;  %v37_v0 = vld [vmem:[#allocation5] sm:$0xf]  ;;  %v36_v1 = vld [vmem:[#allocation2] sm:$0xf]  ;;  %v41_v2 = vlaneseq }
  0x26   :  { %66 = vrcp.f32 %v37_v0  ;;  %s142_s4 = smov [#allocation7]  }
  0x27   :  { %s52_s5 = sshll.u32 %s142_s4, 4  ;;  %vm43_vm0 = vcmp.lt.s32.totalorder %v41_v2, 512  ;;  %s53_s5 = int_to_ptr.vmem [resolvable:$true] %s52_s5 }
  0x28   :  { %s112_s6 = scalar_lea.vmem %s53_s5, 64  ;;  %p117_p3 = scmp.lt.s32.totalorder %s53_s5, %s53_s5 }
  0x29   :  { %p113_p2 = scmp.ne.s32.totalorder %s53_s5, %s112_s6  ;;  %p118_p4 = scmp.lt.s32.totalorder %s112_s6, %s112_s6 }
  0x2b   :  { %p119_p5 = por %p118_p4, %p117_p3 }
  0x2d   :  { %p120_p6 = pnand %p119_p5, %p113_p2 }
  0x30   :  { %v67_v3 = vpop.eup %66 }
  0x31   :  { %v39_v4 = vmul.f32 %v67_v3, %v36_v1 }
  0x33   :  { %v62_v5 = vround.rtne.f32 %v39_v4 }
  0x35   :  { %45 = vst.msk [vmem:[#allocation7] sm:$0xf] %vm43_vm0, %v62_v5 }
  0x36   :  { %123 = shalt.err (!%p120_p6)
}
  0x37   :  { %s124_s8 = scalar_lea.hbm %s196_s2, 64 }
  0x38   :  { %p125_p7 = scmp.ne.s32.totalorder %s196_s2, %s124_s8  ;;  %p128_p8 = scmp.lt.u32.totalorder %s124_s8, %s196_s2 }
  0x3a   :  { %p130_p9 = pnand %p128_p8, %p125_p7 }
  0x3c   :  { %133 = shalt.err (!%p130_p9)
}
  0x3d   :  { %55 = dma.vmem_to_hbm [thread:$0]  %s53_s5, 64, %s196_s2, [#allocation4]  }
  0x3e   :  { %138 = dma.done.wait [#allocation4], 64  }
  0x3f   :  { %139 = vsyncadd [#allocation4], 4294967232 }
  0x40   :  { %59 = vsyncpa [#allocation3], 1 }
  0x41   :  { %60 = vsyncpa [#allocation6], 1 }
  0x42   :  { %61 = vsyncpa [#allocation4], 1 }

</bundles_post_ra>
